<compile_context>
chip_gen: v7x
topology: tpu7x:2x2x1
jax: 0.10.0
libtpu: 0.0.40
codegen_flags: <defaults>
</compile_context>

<pallas_src>
import jax
import jax.numpy as jnp
from jax.experimental import pallas as pl
from jax.experimental.pallas import tpu as pltpu


# ---------------------------------------------------------------------------
# Kernels: one (Nb, Cb, Sb) activation tile per grid step; weight/bias arrive
# as a (1, Cb, 1) VMEM tile that broadcasts over batch and lane (spatial) dims
# in a single VPU pass.
# ---------------------------------------------------------------------------
def _scale_bias_kernel(x_ref, w_ref, b_ref, o_ref):
    o_ref[...] = (x_ref[...] * w_ref[...] + b_ref[...]).astype(o_ref.dtype)


def _scale_kernel(x_ref, w_ref, o_ref):
    o_ref[...] = (x_ref[...] * w_ref[...]).astype(o_ref.dtype)


def _pick_tiles(N, C, HW, itemsize, target_bytes):
    """Choose (Nb, Cb, Sb) so each tile is ~target_bytes, lane-dense, and legal
    w.r.t. the (sublane, 128) tiling constraints for the given dtype."""
    # Sublane granularity: 8 for 32-bit, 16 for bf16, 32 for int8, ...
    sublane = max(8, 8 * (4 // max(1, itemsize)))

    # Spatial (lane) block: full HW if it fits, else a multiple of 128.
    if HW * itemsize <= target_bytes:
        Sb = HW
    else:
        Sb = max(128, (target_bytes // itemsize) // 128 * 128)
        Sb = min(Sb, HW)

    # Channel (sublane) block: full C if it fits, else a multiple of `sublane`.
    row_bytes = Sb * itemsize
    if C * row_bytes <= target_bytes:
        Cb = C
    else:
        cb = target_bytes // max(1, row_bytes)
        cb = (cb // sublane) * sublane if cb >= sublane else sublane
        Cb = min(int(cb), C)

    # Batch block: only batch up whole (C, HW) slabs (keeps DMAs contiguous).
    if Cb == C and Sb == HW:
        slab = C * HW * itemsize
        Nb = max(1, min(N, int(target_bytes // max(1, slab))))
    else:
        Nb = 1
    return Nb, Cb, Sb


def scale_forward(x, weight, bias=None, *, target_tile_bytes=1 << 20):
    """Pallas equivalent of Scale.forward: y = x * weight (+ bias).

    x:      (N, C, H, W)
    weight: (1, C, 1, 1)
    bias:   (1, C, 1, 1) or None
    """
    N, C, H, W = x.shape
    HW = H * W
    itemsize = jnp.dtype(x.dtype).itemsize

    # Lane-dense view: collapse spatial dims so the last (lane) dim is H*W.
    x3 = x.reshape(N, C, HW)
    # Pre-cast params to the activation dtype (avoids mixed-precision VPU work
    # and implicit f32 promotion of every x element).
    w3 = weight.reshape(1, C, 1).astype(x.dtype)
    b3 = bias.reshape(1, C, 1).astype(x.dtype) if bias is not None else None

    Nb, Cb, Sb = _pick_tiles(N, C, HW, itemsize, target_tile_bytes)
    # Channel-block axis is the SLOWEST grid axis so the (1, Cb, 1) param tile
    # only changes (and is only re-DMA'd) once per channel block.
    grid = (pl.cdiv(C, Cb), pl.cdiv(N, Nb), pl.cdiv(HW, Sb))

    x_spec = pl.BlockSpec((Nb, Cb, Sb), lambda ci, ni, si: (ni, ci, si))
    p_spec = pl.BlockSpec((1, Cb, 1), lambda ci, ni, si: (0, ci, 0))
    o_spec = pl.BlockSpec((Nb, Cb, Sb), lambda ci, ni, si: (ni, ci, si))

    if bias is not None:
        kernel = _scale_bias_kernel
        in_specs = [x_spec, p_spec, p_spec]
        args = (x3, w3, b3)
    else:
        kernel = _scale_kernel
        in_specs = [x_spec, p_spec]
        args = (x3, w3)

    # Explicit VMEM budget: in + out tiles double-buffered, plus padded param
    # tiles and slack.  Stays inside v5e's 16 MiB default scoped VMEM and well
    # under v7x's 32 MiB scope / 64 MiB physical.
    tile_bytes = Nb * Cb * Sb * itemsize
    vmem_limit = 4 * tile_bytes + 4 * (8 * 128 * itemsize) + (2 << 20)
    vmem_limit = int(min(max(vmem_limit, 8 << 20), 32 << 20))

    out3 = pl.pallas_call(
        kernel,
        out_shape=jax.ShapeDtypeStruct((N, C, HW), x.dtype),
        grid_spec=pltpu.PrefetchScalarGridSpec(
            num_scalar_prefetch=0,
            grid=grid,
            in_specs=in_specs,
            out_specs=o_spec,
        ),
        compiler_params=pltpu.CompilerParams(
            dimension_semantics=("parallel", "parallel", "parallel"),
            vmem_limit_bytes=vmem_limit,
        ),
    )(*args)
    return out3.reshape(N, C, H, W)


class ScalePallas:
    """Mirror of the PyTorch Scale module (deterministic init, no checkpoint)."""

    def __init__(self, nchannels, bias=True, init_scale=1.0, dtype=jnp.float32):
        self.nchannels = nchannels
        self.weight = jnp.full((1, nchannels, 1, 1), init_scale, dtype=dtype)
        self.bias = jnp.zeros((1, nchannels, 1, 1), dtype=dtype) if bias else None

    def __call__(self, x):
        return scale_forward(x, self.weight, self.bias)


if __name__ == "__main__":
    k0, k1, k2 = jax.random.split(jax.random.PRNGKey(0), 3)

    # --- primary test: small shapes consistent with the module ---
    N, C, H, W = 2, 4, 16, 16
    x = jax.random.normal(k0, (N, C, H, W), dtype=jnp.float32)

    mod = ScalePallas(nchannels=C, bias=True, init_scale=1.5)
    # Non-trivial, deterministic bias set in-script so both terms are exercised.
    mod.bias = jnp.arange(C, dtype=jnp.float32).reshape(1, C, 1, 1) * 0.1

    y = jax.block_until_ready(scale_forward(x, mod.weight, mod.bias))
    y_ref = x * mod.weight + mod.bias
    assert y.shape == x.shape and y.dtype == x.dtype
    assert jnp.allclose(y, y_ref, atol=1e-6, rtol=1e-6)

    # --- bias=None path ---
    mod_nb = ScalePallas(nchannels=C, bias=False, init_scale=2.0)
    y_nb = jax.block_until_ready(scale_forward(x, mod_nb.weight, None))
    assert jnp.allclose(y_nb, x * mod_nb.weight, atol=1e-6, rtol=1e-6)

    # --- mixed-precision path: bf16 activations, f32 params (pre-cast inside) ---
    xb = x.astype(jnp.bfloat16)
    yb = jax.block_until_ready(scale_forward(xb, mod.weight, mod.bias))
    assert yb.dtype == jnp.bfloat16
    yb_ref = xb * mod.weight.astype(jnp.bfloat16) + mod.bias.astype(jnp.bfloat16)
    assert jnp.allclose(
        yb.astype(jnp.float32), yb_ref.astype(jnp.float32), atol=2e-2, rtol=2e-2
    )

    # --- forced channel-blocking + partial edge-block path (tiny tile target) ---
    N2, C2, H2, W2 = 2, 20, 9, 40
    x2 = jax.random.normal(k1, (N2, C2, H2, W2), dtype=jnp.float32)
    w2 = jax.random.normal(k2, (1, C2, 1, 1), dtype=jnp.float32) * 0.5 + 1.0
    b2 = jnp.linspace(-1.0, 1.0, C2, dtype=jnp.float32).reshape(1, C2, 1, 1)
    y2 = jax.block_until_ready(
        scale_forward(x2, w2, b2, target_tile_bytes=4096)
    )
    assert jnp.allclose(y2, x2 * w2 + b2, atol=1e-6, rtol=1e-6)

    print("KERNEL_OK")
</pallas_src>

<mosaic_0001>
module attributes {stable_mosaic.version = 11 : i64} {
  func.func @_scale_bias_kernel(%arg0: i32, %arg1: i32, %arg2: i32, %arg3: memref<2x4x256xf32, #tpu.memory_space<vmem>>, %arg4: memref<1x4x1xf32, #tpu.memory_space<vmem>>, %arg5: memref<1x4x1xf32, #tpu.memory_space<vmem>>, %arg6: memref<2x4x256xf32, #tpu.memory_space<vmem>>) attributes {dimension_semantics = [#tpu.dimension_semantics<parallel>, #tpu.dimension_semantics<parallel>, #tpu.dimension_semantics<parallel>], iteration_bounds = array<i64: 1, 1, 1>, scalar_prefetch = 0 : i64, scratch_operands = 0 : i64, tpu.core_type = #tpu.core_type<tc>, window_params = [{transform_indices = @transform_0, window_bounds = array<i64: 2, 4, 256>}, {transform_indices = @transform_1, window_bounds = array<i64: 1, 4, 1>}, {transform_indices = @transform_2, window_bounds = array<i64: 1, 4, 1>}, {transform_indices = @transform_3, window_bounds = array<i64: 2, 4, 256>}]} {
    %c0 = arith.constant 0 : index
    %c0_0 = arith.constant 0 : index
    %c0_1 = arith.constant 0 : index
    %0 = vector.load %arg3[%c0, %c0_0, %c0_1] : memref<2x4x256xf32, #tpu.memory_space<vmem>>, vector<2x4x256xf32>
    %c0_2 = arith.constant 0 : index
    %c0_3 = arith.constant 0 : index
    %c0_4 = arith.constant 0 : index
    %1 = vector.load %arg4[%c0_2, %c0_3, %c0_4] : memref<1x4x1xf32, #tpu.memory_space<vmem>>, vector<1x4x1xf32>
    %2 = vector.broadcast %1 : vector<1x4x1xf32> to vector<2x4x256xf32>
    %3 = arith.mulf %0, %2 : vector<2x4x256xf32>
    %c0_5 = arith.constant 0 : index
    %c0_6 = arith.constant 0 : index
    %c0_7 = arith.constant 0 : index
    %4 = vector.load %arg5[%c0_5, %c0_6, %c0_7] : memref<1x4x1xf32, #tpu.memory_space<vmem>>, vector<1x4x1xf32>
    %5 = vector.broadcast %4 : vector<1x4x1xf32> to vector<2x4x256xf32>
    %6 = arith.addf %3, %5 : vector<2x4x256xf32>
    %c0_8 = arith.constant 0 : index
    %c0_9 = arith.constant 0 : index
    %c0_10 = arith.constant 0 : index
    %7 = vector.load %arg6[%c0_8, %c0_9, %c0_10] : memref<2x4x256xf32, #tpu.memory_space<vmem>>, vector<2x4x256xf32>
    tpu.vector_store %arg6[%c0_8, %c0_9, %c0_10], %6 {strides = array<i32>} : memref<2x4x256xf32, #tpu.memory_space<vmem>>, vector<2x4x256xf32>,
    return
  }
  func.func @transform_0(%arg0: i32, %arg1: i32, %arg2: i32) -> (i32, i32, i32) {
    %c0_i32 = arith.constant 0 : i32
    return %arg1, %arg0, %arg2 : i32, i32, i32
  }
  func.func @transform_1(%arg0: i32, %arg1: i32, %arg2: i32) -> (i32, i32, i32) {
    %c0_i32 = arith.constant 0 : i32
    %c0_i32_0 = arith.constant 0 : i32
    %c0_i32_1 = arith.constant 0 : i32
    return %c0_i32, %arg0, %c0_i32_0 : i32, i32, i32
  }
  func.func @transform_2(%arg0: i32, %arg1: i32, %arg2: i32) -> (i32, i32, i32) {
    %c0_i32 = arith.constant 0 : i32
    %c0_i32_0 = arith.constant 0 : i32
    %c0_i32_1 = arith.constant 0 : i32
    return %c0_i32, %arg0, %c0_i32_0 : i32, i32, i32
  }
  func.func @transform_3(%arg0: i32, %arg1: i32, %arg2: i32) -> (i32, i32, i32) {
    %c0_i32 = arith.constant 0 : i32
    return %arg1, %arg0, %arg2 : i32, i32, i32
  }
}

</mosaic_0001>

<bundles_post_ra>
// kernel: tpu_custom_call.1
= control target key start
LH: loop header
LB: loop body
LE: loop exit
PB: predicated region body
PF: predicated region fallthrough
CT: control target
= control target key end

     0   :  { %8 = vsyncpa [#allocation3], 0  ;;  %s197_s0 = inlined_call_operand.hbm [shape: f32[2,4,256], index: 0, kind: input, shape index: {}]   ;;  %s198_s1 = inlined_call_operand.vmem [shape: f32[1,4,1], index: 1, kind: input, shape index: {}]   ;;  %s199_s2 = inlined_call_operand.vmem [shape: f32[1,4,1], index: 2, kind: input, shape index: {}]   ;;  %s200_s3 = inlined_call_operand.hbm [shape: f32[2,4,256], index: 3, kind: output, shape index: {}]  }
   0x1   :  { %9 = vsyncpa [#allocation4], 0  ;;  %s135_s12 = smov [#allocation2]   ;;  %s87_s16 = scalar_lea.hbm %s197_s0, 256 }
   0x2   :  { %s15_s13 = sshll.u32 %s135_s12, 4  ;;  %p88_p0 = scmp.ne.s32.totalorder %s197_s0, %s87_s16  ;;  %s16_s13 = int_to_ptr.vmem [resolvable:$true] %s15_s13 }
   0x3   :  { %p91_p1 = scmp.lt.u32.totalorder %s87_s16, %s197_s0 }
   0x5   :  { %p93_p2 = pnand %p91_p1, %p88_p0 }
   0x7   :  { %96 = shalt.err (!%p93_p2)
}
   0x8   :  { %s97_s21 = scalar_lea.vmem %s16_s13, 256  ;;  %p102_p4 = scmp.lt.s32.totalorder %s16_s13, %s16_s13 }
   0x9   :  { %p98_p3 = scmp.ne.s32.totalorder %s16_s13, %s97_s21  ;;  %p103_p5 = scmp.lt.s32.totalorder %s97_s21, %s97_s21 }
   0xb   :  { %p104_p6 = por %p103_p5, %p102_p4 }
   0xd   :  { %p105_p7 = pnand %p104_p6, %p98_p3 }
   0xf   :  { %108 = shalt.err (!%p105_p7)
}
  0x10   :  { %s136_s22 = smov 128   ;;  %s137_s23 = smov 8  }
  0x11   :  { %21 = dma.hbm_to_vmem [thread:$0]  %s197_s0, 256, %s16_s13, [#allocation3], %s136_s22, %s136_s22, %s137_s23  }
  0x12   :  { %131 = dma.done.wait [#allocation3], 256  }
  0x13   :  { %132 = vsyncadd [#allocation3], 4294967040  ;;  %v138_v0 = vmov 0   ;;  %v31_v1 = vld [vmem:[%s198_s1] sm:$0xf]  ;;  %v39_v5 = vlaneseq  ;;  %v30_v12 = vld [vmem:[#allocation2 + $0x8] sm:$0xff] }
  0x14   :  { %86 = vset.pattern.permute.xlu0 %v138_v0  ;;  %v46_v2 = vld [vmem:[%s199_s2] sm:$0xf]  ;;  %v139_v3 = vmov 839922192   ;;  %s140_s0 = smov [#allocation5]  }
  0x15   :  { %34 = vperm.xlu0 %86, %v31_v1   ;;  %v37_v4 = vunpack.c.l.s4 %v139_v3  ;;  %v40_v7 = vshrl.u32 %v39_v5, 7  ;;  %v29_v11 = vld [vmem:[#allocation2] sm:$0xff]  ;;  %s68_s30 = sshll.u32 %s140_s0, 4  ;;  %s69_s30 = int_to_ptr.vmem [resolvable:$true] %s68_s30 }
  0x16   :  { %s109_s1 = scalar_lea.vmem %s69_s30, 256  ;;  %p114_p9 = scmp.lt.s32.totalorder %s69_s30, %s69_s30 }
  0x17   :  { %v38_v6 = vunpack.c.0.s8 %v37_v4  ;;  %p110_p8 = scmp.ne.s32.totalorder %s69_s30, %s109_s1  ;;  %p115_p10 = scmp.lt.s32.totalorder %s109_s1, %s109_s1 }
  0x19   :  { %49 = vperm.xlu0 %86, %v46_v2   ;;  %v41_v8 = vsub.s32 %v38_v6, %v40_v7  ;;  %p116_p11 = por %p115_p10, %p114_p9 }
  0x1b   :  { %p117_p12 = pnand %p116_p11, %p110_p8 }
  0x94   :  { %v35_v9 = vpop.permute.xlu0 %34 }
  0x95   :  { %v42_v10 = vrot.slane %v35_v9, %v41_v8 }
  0x97   :  { %v44_v14 = vmul.f32 %v42_v10, %v29_v11  ;;  %v45_v15 = vmul.f32 %v42_v10, %v30_v12 }
  0x98   :  { %v50_v13 = vpop.permute.xlu0 %49 }
  0x99   :  { %v57_v16 = vrot.slane %v50_v13, %v41_v8 }
  0x9b   :  { %v59_v17 = vadd.f32 %v57_v16, %v44_v14  ;;  %v60_v18 = vadd.f32 %v57_v16, %v45_v15 }
  0x9d   :  { %61 = vst [vmem:[#allocation5] sm:$0xff] %v59_v17  ;;  %62 = vst [vmem:[#allocation5 + $0x8] sm:$0xff] %v60_v18 }
  0x9e   :  { %120 = shalt.err (!%p117_p12)
}
  0x9f   :  { %s121_s5 = scalar_lea.hbm %s200_s3, 256 }
  0xa0   :  { %p122_p13 = scmp.ne.s32.totalorder %s200_s3, %s121_s5  ;;  %p125_p0 = scmp.lt.u32.totalorder %s121_s5, %s200_s3 }
  0xa2   :  { %p127_p1 = pnand %p125_p0, %p122_p13 }
  0xa4   :  { %130 = shalt.err (!%p127_p1)
}
  0xa5   :  { %74 = dma.vmem_to_hbm [thread:$0]  %s69_s30, 256, %s200_s3, [#allocation4], %s136_s22, %s136_s22, %s137_s23  }
  0xa6   :  { %133 = dma.done.wait [#allocation4], 256  }
  0xa7   :  { %134 = vsyncadd [#allocation4], 4294967040 }
  0xa8   :  { %78 = vsyncpa [#allocation3], 1 }
  0xa9   :  { %79 = vsyncpa [#allocation4], 1 }

</bundles_post_ra>
